<compile_context>
chip_gen: v5e
topology: v5e:2x2
jax: 0.10.0
libtpu: 0.0.40
codegen_flags: <defaults>
</compile_context>

<pallas_src>
import jax
import jax.numpy as jnp
from jax.experimental import pallas as pl
from jax.experimental.pallas import tpu as pltpu

LANES = 128
SUBLANES = 8


def _ceil_div(a, b):
    return -(-a // b)


def onedimnet_kernel(coeff_ref, x_ref, o_ref):
    # y = ReLU(x) * coeff  -- pure VPU elementwise on a lane-dense tile;
    # coeff is a single SMEM scalar (no VMEM weight buffers, no per-tile reduce).
    o_ref[...] = jnp.maximum(x_ref[...], 0.0) * coeff_ref[0]


def onedimnet_forward(x, w1, w2, *, max_tile_rows=1024):
    """x: (N, 1) f32; w1: (H, 1) f32 = Linear(1,H).weight; w2: (1, H) f32 = Linear(H,1).weight.

    Implements OneDimNet.forward with monotone=True, hidden=H (clamp -> linear -> relu -> linear).
    """
    N = x.shape[0]

    # Monotone clamp + exact algebraic collapse of the 1->H->1 net into one
    # scalar coefficient (valid only because the clamp forces w1 >= 0).
    # This is a 16-element reduce -- negligible, fused by XLA in the wrapper.
    coeff = jnp.sum(
        jnp.maximum(w1, 0.0).reshape(-1) * jnp.maximum(w2, 0.0).reshape(-1)
    ).reshape(1).astype(jnp.float32)

    # ---- lane-dense slab sizing -------------------------------------------
    rows_needed = _ceil_div(N, LANES)
    rows_needed = _ceil_div(rows_needed, SUBLANES) * SUBLANES

    max_tile_rows = max(SUBLANES, (int(max_tile_rows) // SUBLANES) * SUBLANES)

    # Enough tiles that each tile <= max_tile_rows; when there is more than a
    # couple of sublane-groups of work, force an even tile count >= 2 so the
    # "parallel" grid axis actually shards across v7x's 2 TensorCores
    # (harmless no-op on single-TC v5e/v6e).
    n_tiles = _ceil_div(rows_needed, max_tile_rows)
    if rows_needed > 2 * SUBLANES:
        n_tiles = max(n_tiles, 2)
    if n_tiles > 1 and (n_tiles % 2):
        n_tiles += 1

    # Size tiles as evenly as possible (sublane-rounded): over-padding is now
    # bounded by n_tiles * 8 rows instead of up to a whole tile.
    tile_rows = _ceil_div(_ceil_div(rows_needed, n_tiles), SUBLANES) * SUBLANES
    rows = n_tiles * tile_rows

    # ---- layout plumbing (metadata-only when N fills the slab exactly) -----
    pad = rows * LANES - N
    x_flat = x.reshape(-1)
    if pad:
        x_flat = jnp.pad(x_flat, (0, pad))  # padded tail -> ReLU(0)*coeff = 0, sliced off below
    x_slab = x_flat.reshape(rows, LANES)

    # Tight, generation-safe VMEM budget: ~2x double-buffered in + out tiles
    # plus slack (well under v5e's 16 MiB scoped default).
    tile_bytes = tile_rows * LANES * 4
    vmem_limit = min(32 * 1024 * 1024, max(4 * 1024 * 1024, 4 * tile_bytes + (1 << 20)))

    out_slab = pl.pallas_call(
        onedimnet_kernel,
        out_shape=jax.ShapeDtypeStruct((rows, LANES), jnp.float32),
        grid_spec=pltpu.PrefetchScalarGridSpec(
            num_scalar_prefetch=0,
            grid=(n_tiles,),
            in_specs=[
                pl.BlockSpec(memory_space=pltpu.MemorySpace.SMEM),    # coeff scalar, SMEM
                pl.BlockSpec((tile_rows, LANES), lambda i: (i, 0)),   # x tile, lane-dense
            ],
            out_specs=pl.BlockSpec((tile_rows, LANES), lambda i: (i, 0)),
        ),
        compiler_params=pltpu.CompilerParams(
            dimension_semantics=("parallel",),  # batch tiles are independent
            vmem_limit_bytes=vmem_limit,
        ),
    )(coeff, x_slab)

    # Back to the module's (N, 1) output; pure metadata when pad == 0.
    out_flat = out_slab.reshape(-1)
    if pad:
        out_flat = out_flat[:N]
    return out_flat.reshape(N, 1)


if __name__ == "__main__":
    key = jax.random.PRNGKey(0)
    k_x, k_w1, k_w2 = jax.random.split(key, 3)

    H = 16  # hidden (OneDimNet default)

    # deterministic parameters (init: normal(mean=0, std=0.05))
    w1 = 0.05 * jax.random.normal(k_w1, (H, 1), dtype=jnp.float32)  # Linear(1, H).weight
    w2 = 0.05 * jax.random.normal(k_w2, (1, H), dtype=jnp.float32)  # Linear(H, 1).weight

    # pure-JAX reference of the PyTorch forward (clamp -> linear -> relu -> linear)
    w1c = jnp.maximum(w1, 0.0)
    w2c = jnp.maximum(w2, 0.0)

    def ref(x):
        return jnp.maximum(x @ w1c.T, 0.0) @ w2c.T

    # Case 1: N=4096 -> slab fits exactly (no pad / no output slice), 2 even tiles.
    x1 = jax.random.normal(k_x, (4096, 1), dtype=jnp.float32)
    y1 = jax.block_until_ready(onedimnet_forward(x1, w1, w2))
    assert jnp.allclose(y1, ref(x1), atol=1e-6)

    # Case 2: odd N -> exercises the (minimal) padding + slice path, single tile.
    x2 = jax.random.normal(k_x, (1000, 1), dtype=jnp.float32)
    y2 = jax.block_until_ready(onedimnet_forward(x2, w1, w2))
    assert jnp.allclose(y2, ref(x2), atol=1e-6)

    print("KERNEL_OK")
</pallas_src>

<mosaic_0001>
module attributes {stable_mosaic.version = 11 : i64} {
  func.func @onedimnet_kernel(%arg0: i32, %arg1: memref<1xf32, #tpu.memory_space<smem>>, %arg2: memref<16x128xf32, #tpu.memory_space<vmem>>, %arg3: memref<16x128xf32, #tpu.memory_space<vmem>>) attributes {dimension_semantics = [#tpu.dimension_semantics<parallel>], iteration_bounds = array<i64: 2>, scalar_prefetch = 0 : i64, scratch_operands = 0 : i64, tpu.core_type = #tpu.core_type<tc>, window_params = [{transform_indices = @transform_0, window_bounds = array<i64: 1>}, {transform_indices = @transform_1, window_bounds = array<i64: 16, 128>}, {transform_indices = @transform_2, window_bounds = array<i64: 16, 128>}]} {
    %c0 = arith.constant 0 : index
    %c0_0 = arith.constant 0 : index
    %0 = vector.load %arg2[%c0, %c0_0] : memref<16x128xf32, #tpu.memory_space<vmem>>, vector<16x128xf32>
    %cst = arith.constant 0.000000e+00 : f32
    %1 = vector.broadcast %cst : f32 to vector<16x128xf32>
    %2 = arith.maximumf %0, %1 : vector<16x128xf32>
    %c0_1 = arith.constant 0 : index
    %3 = memref.load %arg1[%c0_1] : memref<1xf32, #tpu.memory_space<smem>>
    %4 = vector.broadcast %3 : f32 to vector<16x128xf32>
    %5 = arith.mulf %2, %4 : vector<16x128xf32>
    %c0_2 = arith.constant 0 : index
    %c0_3 = arith.constant 0 : index
    %6 = vector.load %arg3[%c0_2, %c0_3] : memref<16x128xf32, #tpu.memory_space<vmem>>, vector<16x128xf32>
    tpu.vector_store %arg3[%c0_2, %c0_3], %5 {strides = array<i32>} : memref<16x128xf32, #tpu.memory_space<vmem>>, vector<16x128xf32>,
    return
  }
  func.func @transform_0(%arg0: i32) -> i32 {
    %c0_i32 = arith.constant 0 : i32
    %c0_i32_0 = arith.constant 0 : i32
    return %c0_i32 : i32
  }
  func.func @transform_1(%arg0: i32) -> (i32, i32) {
    %c0_i32 = arith.constant 0 : i32
    %c0_i32_0 = arith.constant 0 : i32
    return %arg0, %c0_i32 : i32, i32
  }
  func.func @transform_2(%arg0: i32) -> (i32, i32) {
    %c0_i32 = arith.constant 0 : i32
    %c0_i32_0 = arith.constant 0 : i32
    return %arg0, %c0_i32 : i32, i32
  }
}

</mosaic_0001>

<bundles_post_ra>
// kernel: tpu_custom_call.1
= control target key start
LH: loop header
LB: loop body
LE: loop exit
PB: predicated region body
PF: predicated region fallthrough
CT: control target
= control target key end

     0   :  { %s579_s0 = inlined_call_operand.<no memory space> [shape: f32[1], index: 0, kind: input, shape index: {}]   ;;  %s580_s1 = inlined_call_operand.hbm [shape: f32[32,128], index: 1, kind: input, shape index: {}]   ;;  %s581_s2 = inlined_call_operand.hbm [shape: f32[32,128], index: 2, kind: output, shape index: {}]  }
   0x1   :  { %7 = sst [smem:[#allocation2]] %s579_s0 }
   0x2   :  { %8 = vsyncpa [#allocation4], 0 }
   0x3   :  { %10 = vsyncpa [#allocation4 + $0x1], 0 }
   0x4   :  { %11 = vsyncpa [#allocation5], 0 }
   0x5   :  { %13 = vsyncpa [#allocation5 + $0x1], 0  ;;  %s452_s11 = smov 0   ;;  %s454_s12 = smov 0  }
   0x6   :  { %s456_s13 = smov 0   ;;  %s458_s14 = smov 0  }
   0x7 LB: > { %s473_s0 = sadd.s32 4294967295, %s428_s14   ;;  %s266_s15 = sadd.s32 4294967294, %s428_s14   ;;  %s428_s14 = sphi %s458_s14, %s591_s14   ;;  %s424_s13 = sphi %s456_s13, %s590_s13   ;;  %s420_s12 = sphi %s454_s12, %s589_s12   ;;  %s416_s11 = sphi %s452_s11, %s588_s11  }
   0x8   : > { %s477_s16 = sadd.s32 1, %s428_s14   ;;  %s47_s17 = sadd.s32 1, %s424_s13 }
   0x9   : > { %s44_s18 = ssub.s32 %s428_s14, %s477_s16  ;;  %p54_p0 = scmp.ne.s32.totalorder %s424_s13, %s420_s12 }
   0xa   : > { %p45_p1 = scmp.eq.s32.totalorder %s44_s18, 0  ;;  %p55_p2 = scmp.eq.s32.totalorder %s428_s14, 0 }
   0xb   : > { %p60_p3 = scmp.ne.s32.totalorder %s420_s12, %s416_s11  ;;  %p61_p4 = scmp.eq.s32.totalorder %s473_s0, 0 }
   0xc   : > { %s489_s19 = scalar_select %p45_p1, %s424_s13, %s47_s17  }
   0xd   : > { %p491_p5 = por %p55_p2, %p54_p0  ;;  %p495_p6 = por %p61_p4, %p60_p3 }
   0xe   : > { %p84_p7 = scmp.eq.s32.totalorder %s473_s0, 1  ;;  %p90_p8 = scmp.eq.s32.totalorder %s266_s15, 1 }
   0xf   : > { %p294_p10 = scmp.lt.s32.totalorder %s428_s14, 2  ;;  %s113_s24 = sand.u32 1, %s424_s13  }
  0x10   : > { %p502_p11 = por %p84_p7, %p54_p0  ;;  %p506_p12 = por %p90_p8, %p60_p3 }
  0x11   : > { %s280_s25 = sshll.u32 %s428_s14, 4  ;;  %s269_s26 = sshll.u32 %s113_s24, 4 }
  0x12   : > { %s122_s29 = scalar_lea.hbm %s580_s1, %s280_s25  ;;  %s117_s3 = scalar_lea.vmem [#allocation3], %s269_s26 }
  0x13   : > { %s123_s30 = sshll.u32 %s122_s29, 4  ;;  %s125_s4 = sshll.u32 %s117_s3, 4  ;;  %s124_s30 = int_to_ptr.hbm [resolvable:$true] %s123_s30  ;;  %s126_s4 = int_to_ptr.vmem [resolvable:$true] %s125_s4 }
  0x14   : > { %p517_p13 = pnand %p294_p10, %p491_p5  ;;  %p272_p0 = scmp.ge.s32.totalorder %s428_s14, 1 }
  0x15   : > { %p133_p1 = scmp.lt.s32.totalorder %s428_s14, 3  ;;  %s114_s6 = scalar_lea.sflag [#allocation4], %s113_s24 }
  0x16   : > { %s332_s7 = sshra.s32 %s124_s30, 4  ;;  %p336_p3 = pneg %p517_p13  ;;  %s333_s7 = int_to_ptr.hbm [resolvable:$true] %s332_s7 }
  0x17   : > { %s334_s8 = scalar_lea.hbm %s333_s7, 16  ;;  %s339_s15 = scalar_lea.hbm %s580_s1, 32 }
  0x18   : > { %p335_p2 = scmp.ne.s32.totalorder %s333_s7, %s334_s8  ;;  %p340_p5 = scmp.lt.s32.totalorder %s333_s7, %s580_s1 }
  0x19   : > { %p341_p8 = scmp.lt.s32.totalorder %s339_s15, %s334_s8 }
  0x1a   : > { %p337_p4 = pnand %p336_p3, %p335_p2 }
  0x1b   : > { %p342_p10 = por %p341_p8, %p340_p5 }
  0x1c   : > { %p338_p7 = pneg %p337_p4 }
  0x1e   : > { %p343_p9 = pnand %p342_p10, %p338_p7 }
  0x20   : > { %346 = shalt.err (!%p343_p9)
}
  0x21   : > { %s430_s20 = smov 128   ;;  %s431_s24 = smov 8  }
  0x22   : > { %289 = dma.hbm_to_vmem [thread:$0]  (!%p517_p13), %s124_s30, 256, %s126_s4, %s114_s6, %s430_s20, %s430_s20, %s431_s24  }
  0x23   : > { %p134_p2 = pnand %p272_p0, %p133_p1 }
  0x24   : > { %s538_s25 = sand.u32 (!%p134_p2), 1, %s420_s12  }
  0x25   : > { %137 = sbr.rel (%p134_p2) target bundleno = 59 (0x3b), region = 28  ;;  %s273_s26 = sshll.u32 (!%p134_p2), %s538_s25, 4 }
  0x26   : > { %s140_s27 = scalar_lea.sflag (!%p134_p2), [#allocation4], %s538_s25  ;;  %s143_s28 = scalar_lea.vmem (!%p134_p2), [#allocation3], %s273_s26 }
  0x2a   : > { %407 = dma.done.wait (%p495_p6), %s140_s27, 256  }
  0x2b   : > { %409 = vsyncadd (%p495_p6), %s140_s27, 4294967040  ;;  %s171_s29 = sld [smem:[#allocation2]]  ;;  %s281_s30 = sshll.u32 %s473_s0, 4  ;;  %v167_v0 = vld [vmem:[%s143_s28] sm:$0xff]  ;;  %v168_v2 = vld [vmem:[%s143_s28 + $0x8] sm:$0xff] }
  0x2c   : > { %s189_s5 = scalar_lea.hbm %s581_s2, %s281_s30  ;;  %s164_s6 = scalar_lea.vmem [#allocation6], %s273_s26  ;;  %v169_v3 = vmax.f32 %v167_v0, 0.0  ;;  %v170_v4 = vmax.f32 %v168_v2, 0.0 }
  0x2d   : > { %s190_s7 = sshll.u32 %s164_s6, 4  ;;  %s192_s8 = sshll.u32 %s189_s5, 4  ;;  %s191_s7 = int_to_ptr.vmem [resolvable:$true] %s190_s7  ;;  %s193_s8 = int_to_ptr.hbm [resolvable:$true] %s192_s8 }
  0x2e   : > { %s178_s0 = scalar_lea.sflag [#allocation5], %s538_s25  ;;  %s376_s21 = sshra.s32 %s193_s8, 4  ;;  %s377_s21 = int_to_ptr.hbm [resolvable:$true] %s376_s21 }
  0x2f   : > { %s378_s9 = scalar_lea.hbm %s377_s21, 16  ;;  %s382_s17 = scalar_lea.hbm %s581_s2, 32 }
  0x30   : > { %p379_p6 = scmp.ne.s32.totalorder %s377_s21, %s378_s9  ;;  %p383_p0 = scmp.lt.s32.totalorder %s377_s21, %s581_s2 }
  0x31   : > { %v172_v1 = vstv %s171_s29  ;;  %p384_p1 = scmp.lt.s32.totalorder %s382_s17, %s378_s9 }
  0x32   : > { %v173_v5 = vmul.f32 %v172_v1, %v169_v3  ;;  %v174_v6 = vmul.f32 %v172_v1, %v170_v4  ;;  %p380_p9 = pnand %p379_p6, %p502_p11 }
  0x33   : > { %p385_p3 = por %p384_p1, %p383_p0 }
  0x34   : > { %175 = vst [vmem:[%s164_s6] sm:$0xff] %v173_v5  ;;  %p381_p13 = pneg %p380_p9 }
  0x35   : > { %176 = vst [vmem:[%s164_s6 + $0x8] sm:$0xff] %v174_v6 }
  0x36   : > { %p386_p4 = pnand %p385_p3, %p381_p13 }
  0x38   : > { %389 = shalt.err (!%p386_p4)
}
  0x39   : > { %s432_s24 = smov 128   ;;  %s433_s25 = smov 8  }
  0x3a   : > { %284 = dma.vmem_to_hbm [thread:$0]  (%p502_p11), %s191_s7, 256, %s193_s8, %s178_s0, %s432_s24, %s432_s24, %s433_s25  }
  0x3b PF: > { %s207_s26 = sand.u32 1, %s416_s11   ;;  %p587_p7 = scmp.ge.s32.totalorder %s428_s14, 2 }
  0x3c   : > { %s208_s27 = scalar_lea.sflag [#allocation5], %s207_s26 }
  0x3d   : > { %p291_p5 = pnand %p587_p7, %p506_p12 }
  0x3f   : > { %p292_p8 = pneg %p291_p5 }
  0x41   : > { %411 = dma.done.wait (%p292_p8), %s208_s27, 256  }
  0x42   : > { %413 = vsyncadd (%p292_p8), %s208_s27, 4294967040  ;;  %p16_p10 = scmp.ge.s32.totalorder %s477_s16, 4   ;;  %s588_s11 = smov %s420_s12 }
  0x43   : > { %s589_s12 = smov %s424_s13  ;;  %s590_s13 = smov %s489_s19 }
  0x44   : > { %s591_s14 = smov %s477_s16  ;;  %18 = sbr.rel (!%p16_p10) target bundleno = 7 (0x7), region = 73 }
  0x49   :  { %214 = vsyncpa [#allocation4], 1 }
  0x4a   :  { %216 = vsyncpa [#allocation4 + $0x1], 1 }
  0x4b   :  { %217 = vsyncpa [#allocation5], 1 }
  0x4c   :  { %219 = vsyncpa [#allocation5 + $0x1], 1 }

</bundles_post_ra>
